<compile_context>
chip_gen: v7x
topology: tpu7x:2x2x1
jax: 0.10.0
libtpu: 0.0.40
codegen_flags: <defaults>
</compile_context>

<pallas_src>
import functools
import math

import jax
import jax.numpy as jnp
from jax.experimental import pallas as pl
from jax.experimental.pallas import tpu as pltpu


def make_inv_freq(dim: int) -> jnp.ndarray:
    # Matches: inv_freq = 1.0 / 10000 ** (torch.arange(0, dim, 2).float() / dim)
    return 1.0 / (10000.0 ** (jnp.arange(0, dim, 2, dtype=jnp.float32) / dim))


def _sinusoidal_kernel_k1(inv_row_ref, out_ref):
    """k == 1 path: out[r, c] = (base + r) * inv_row[c].

    inv_row_ref[s, c] == inv_cat[c] (replicated to 8 sublanes in the wrapper).
    """
    tile_rows, row_width = out_ref.shape
    base = pl.program_id(0) * tile_rows
    r = jax.lax.broadcasted_iota(jnp.int32, (tile_rows, row_width), 0)
    t = (base + r).astype(jnp.float32)
    out_ref[...] = t * inv_row_ref[0:1, :]


def _sinusoidal_kernel_packed(inv_row_ref, col_ref, out_ref, *, rows_per_slab):
    """Packed path: slab element (r, c) is logical row base + r*k + c // dim,
    logical column c % dim.  Column-dependent work is precomputed:
        inv_row_ref[s, c] = inv_cat[c % dim]
        col_ref[s, c]     = (c // dim) * inv_cat[c % dim]
    so:  out[r, c] = (base + r*k) * inv_row[c] + col_term[c]
    using only a sublane (axis-0) iota.
    """
    tile_rows, row_width = out_ref.shape
    base = pl.program_id(0) * (tile_rows * rows_per_slab)
    r = jax.lax.broadcasted_iota(jnp.int32, (tile_rows, row_width), 0)
    t = (base + r * rows_per_slab).astype(jnp.float32)
    out_ref[...] = t * inv_row_ref[0:1, :] + col_ref[0:1, :]


_TARGET_TILE_BYTES = 12 * 1024 * 1024   # per output buffer (x2 for double-buffering)
_VMEM_LIMIT_BYTES = 32 * 1024 * 1024    # == v6e/v7x scoped default, raises v5e's 16 MiB


def _choose_tile_rows(n_rows: int, row_width: int) -> int:
    """Pick the output row tile.

    Large tiles amortize the ~0.35 us per-grid-step overhead; the double-
    buffered output (2 x tile) must stay under the scoped-VMEM limit.  When
    the whole output would fit in one tile but is non-trivial, still split
    into >= 2 grid steps so v7x's two TensorCores can share the row loop.
    """
    cap = max(8, (_TARGET_TILE_BYTES // (row_width * 4)) // 8 * 8)
    if n_rows > cap:
        return cap
    if n_rows >= 64:
        half = (((n_rows + 1) // 2) + 7) // 8 * 8   # ~ceil(n_rows/2), multiple of 8
        return max(8, min(half, cap))
    return n_rows


def sinusoidal_embeddings(x: jnp.ndarray, inv_freq: jnp.ndarray) -> jnp.ndarray:
    """Pallas implementation of SinusoidalEmbeddings.forward(x)."""
    n = x.shape[-2]
    half = inv_freq.shape[-1]
    dim = 2 * half

    # inv_cat[c] = inv_freq[c % half]  (the torch.cat((freqs, freqs), -1) pattern).
    inv_cat = jnp.concatenate([inv_freq, inv_freq]).astype(jnp.float32)   # (dim,)

    # Lane-dense output: pack `k` logical rows per stored slab row so the stored
    # last dim is a multiple of 128 (full-lane, unmasked stores).  When n is not
    # divisible by k we keep the exact (n, dim) layout (k = 1): stores become
    # lane-masked, but splitting off the ragged remainder into a second buffer
    # would force a full-array stitch copy (2x extra HBM traffic) just to fix a
    # handful of rows, which is worse for this write-bound kernel.
    if dim % 128 == 0:
        k = 1
    else:
        k = 128 // math.gcd(dim, 128)
        if n % k != 0:
            k = 1
    n_rows = n // k
    row_width = k * dim

    # Hoist all column-dependent work out of the kernel; replicate constants to
    # 8 sublanes so the in-kernel operand blocks are full (8, W) tiles.
    if k == 1:
        inv_rep = jnp.tile(inv_cat[None, :], (8, 1))                      # (8, dim)
        kernel = _sinusoidal_kernel_k1
        operands = (inv_rep,)
        in_specs = [pl.BlockSpec((8, row_width), lambda i: (0, 0))]
    else:
        inv_row = jnp.tile(inv_cat, (k,))                                 # (row_width,)
        col_idx = (jnp.arange(row_width, dtype=jnp.int32) // dim).astype(jnp.float32)
        col_term = col_idx * inv_row
        inv_rep = jnp.tile(inv_row[None, :], (8, 1))                      # (8, row_width)
        col_rep = jnp.tile(col_term[None, :], (8, 1))                     # (8, row_width)
        kernel = functools.partial(_sinusoidal_kernel_packed, rows_per_slab=k)
        operands = (inv_rep, col_rep)
        in_specs = [pl.BlockSpec((8, row_width), lambda i: (0, 0)),
                    pl.BlockSpec((8, row_width), lambda i: (0, 0))]

    tile_rows = _choose_tile_rows(n_rows, row_width)
    grid = (pl.cdiv(n_rows, tile_rows),)

    emb = pl.pallas_call(
        kernel,
        out_shape=jax.ShapeDtypeStruct((n_rows, row_width), jnp.float32),
        grid=grid,
        in_specs=in_specs,
        out_specs=pl.BlockSpec((tile_rows, row_width), lambda i: (i, 0)),
        compiler_params=pltpu.CompilerParams(
            dimension_semantics=("parallel",),      # lets v7x's 2 TCs split rows
            vmem_limit_bytes=_VMEM_LIMIT_BYTES),
    )(*operands)

    # Contiguous row-major reshape back to the logical layout (free).
    # TODO(synk): emit bf16 / fuse sin+cos here if the consumer allows it; the
    # module's contract is the raw f32 angle table, so we keep f32.
    return emb.reshape(1, n, dim)


def _reference(x, inv_freq):
    n = x.shape[-2]
    t = jnp.arange(n, dtype=inv_freq.dtype)
    freqs = t[:, None] * inv_freq[None, :]
    return jnp.concatenate([freqs, freqs], axis=-1)[None, :, :]


if __name__ == "__main__":
    # 1) Small shape consistent with the module: (batch, seq, dim).
    dim, batch, seq = 32, 2, 8
    key = jax.random.PRNGKey(0)
    x = jax.random.normal(key, (batch, seq, dim), dtype=jnp.float32)
    inv_freq = make_inv_freq(dim)
    emb = jax.block_until_ready(sinusoidal_embeddings(x, inv_freq))
    ref = _reference(x, inv_freq)
    assert emb.shape == (1, seq, dim), emb.shape
    assert emb.dtype == jnp.float32
    assert jnp.allclose(emb, ref, atol=1e-6, rtol=1e-6)

    # 2) Larger k=1 (dim % 128 == 0) path: multi-tile, grid >= 2.
    dim2, seq2 = 256, 8192
    x2 = jnp.zeros((1, seq2, dim2), dtype=jnp.float32)
    inv_freq2 = make_inv_freq(dim2)
    emb2 = jax.block_until_ready(sinusoidal_embeddings(x2, inv_freq2))
    assert emb2.shape == (1, seq2, dim2)
    assert jnp.allclose(emb2, _reference(x2, inv_freq2), atol=1e-5, rtol=1e-6)

    # 3) Larger lane-packed (k > 1) path: multi-tile, grid >= 2.
    dim3, seq3 = 32, 8192
    x3 = jnp.zeros((1, seq3, dim3), dtype=jnp.float32)
    inv_freq3 = make_inv_freq(dim3)
    emb3 = jax.block_until_ready(sinusoidal_embeddings(x3, inv_freq3))
    assert emb3.shape == (1, seq3, dim3)
    assert jnp.allclose(emb3, _reference(x3, inv_freq3), atol=1e-5, rtol=1e-6)

    # 4) Ragged fallback path (dim % 128 != 0 and n % k != 0): correct, masked stores.
    dim4, seq4 = 48, 12
    x4 = jnp.zeros((1, seq4, dim4), dtype=jnp.float32)
    inv_freq4 = make_inv_freq(dim4)
    emb4 = jax.block_until_ready(sinusoidal_embeddings(x4, inv_freq4))
    assert emb4.shape == (1, seq4, dim4)
    assert jnp.allclose(emb4, _reference(x4, inv_freq4), atol=1e-6, rtol=1e-6)

    print("KERNEL_OK")
</pallas_src>

<mosaic_0001>
module attributes {stable_mosaic.version = 11 : i64} {
  func.func @_sinusoidal_kernel_packed(%arg0: i32, %arg1: memref<8x128xf32, #tpu.memory_space<vmem>>, %arg2: memref<8x128xf32, #tpu.memory_space<vmem>>, %arg3: memref<2x128xf32, #tpu.memory_space<vmem>>) attributes {dimension_semantics = [#tpu.dimension_semantics<parallel>], iteration_bounds = array<i64: 1>, scalar_prefetch = 0 : i64, scratch_operands = 0 : i64, tpu.core_type = #tpu.core_type<tc>, window_params = [{pipeline_mode = #tpu.pipeline_mode<synchronous>, transform_indices = @transform_0, window_bounds = array<i64: 8, 128>}, {pipeline_mode = #tpu.pipeline_mode<synchronous>, transform_indices = @transform_1, window_bounds = array<i64: 8, 128>}, {transform_indices = @transform_2, window_bounds = array<i64: 2, 128>}]} {
    %c8_i32 = arith.constant 8 : i32
    %0 = arith.muli %arg0, %c8_i32 : i32
    %1 = tpu.iota {dimensions = array<i32: 0>} : vector<2x128xi32>
    %c4_i32 = arith.constant 4 : i32
    %2 = vector.broadcast %c4_i32 : i32 to vector<2x128xi32>
    %3 = arith.muli %1, %2 : vector<2x128xi32>
    %4 = vector.broadcast %0 : i32 to vector<2x128xi32>
    %5 = arith.addi %4, %3 : vector<2x128xi32>
    %6 = arith.sitofp %5 : vector<2x128xi32> to vector<2x128xf32>
    %c0 = arith.constant 0 : index
    %c0_0 = arith.constant 0 : index
    %7 = vector.load %arg1[%c0, %c0_0] : memref<8x128xf32, #tpu.memory_space<vmem>>, vector<1x128xf32>
    %8 = vector.broadcast %7 : vector<1x128xf32> to vector<2x128xf32>
    %9 = arith.mulf %6, %8 : vector<2x128xf32>
    %c0_1 = arith.constant 0 : index
    %c0_2 = arith.constant 0 : index
    %10 = vector.load %arg2[%c0_1, %c0_2] : memref<8x128xf32, #tpu.memory_space<vmem>>, vector<1x128xf32>
    %11 = vector.broadcast %10 : vector<1x128xf32> to vector<2x128xf32>
    %12 = arith.addf %9, %11 : vector<2x128xf32>
    %c0_3 = arith.constant 0 : index
    %c0_4 = arith.constant 0 : index
    %13 = vector.load %arg3[%c0_3, %c0_4] : memref<2x128xf32, #tpu.memory_space<vmem>>, vector<2x128xf32>
    tpu.vector_store %arg3[%c0_3, %c0_4], %12 {strides = array<i32>} : memref<2x128xf32, #tpu.memory_space<vmem>>, vector<2x128xf32>,
    return
  }
  func.func @transform_0(%arg0: i32) -> (i32, i32) {
    %c0_i32 = arith.constant 0 : i32
    %c0_i32_0 = arith.constant 0 : i32
    %c0_i32_1 = arith.constant 0 : i32
    return %c0_i32, %c0_i32_0 : i32, i32
  }
  func.func @transform_1(%arg0: i32) -> (i32, i32) {
    %c0_i32 = arith.constant 0 : i32
    %c0_i32_0 = arith.constant 0 : i32
    %c0_i32_1 = arith.constant 0 : i32
    return %c0_i32, %c0_i32_0 : i32, i32
  }
  func.func @transform_2(%arg0: i32) -> (i32, i32) {
    %c0_i32 = arith.constant 0 : i32
    %c0_i32_0 = arith.constant 0 : i32
    return %arg0, %c0_i32 : i32, i32
  }
}

</mosaic_0001>

<bundles_post_ra>
// kernel: tpu_custom_call.1
= control target key start
LH: loop header
LB: loop body
LE: loop exit
PB: predicated region body
PF: predicated region fallthrough
CT: control target
= control target key end

     0   :  { %7 = vsyncpa [#allocation3], 0  ;;  %s203_s0 = inlined_call_operand.hbm [shape: f32[8,128], index: 0, kind: input, shape index: {}]   ;;  %s204_s1 = inlined_call_operand.hbm [shape: f32[8,128], index: 1, kind: input, shape index: {}]   ;;  %s205_s2 = inlined_call_operand.hbm [shape: f32[2,128], index: 2, kind: output, shape index: {}]  }
   0x1   :  { %8 = vsyncpa [#allocation6], 0 }
   0x2   :  { %9 = vsyncpa [#allocation4], 0  ;;  %s149_s9 = smov [#allocation2]   ;;  %s150_s11 = smov [#allocation5]  }
   0x3   :  { %s16_s10 = sshll.u32 %s149_s9, 4  ;;  %s26_s12 = sshll.u32 %s150_s11, 4  ;;  %s17_s10 = int_to_ptr.vmem [resolvable:$true] %s16_s10  ;;  %s27_s12 = int_to_ptr.vmem [resolvable:$true] %s26_s12 }
   0x4   :  { %s77_s15 = scalar_lea.hbm %s203_s0, 128 }
   0x5   :  { %p78_p0 = scmp.ne.s32.totalorder %s203_s0, %s77_s15  ;;  %p81_p1 = scmp.lt.u32.totalorder %s77_s15, %s203_s0 }
   0x7   :  { %p83_p2 = pnand %p81_p1, %p78_p0 }
   0x9   :  { %86 = shalt.err (!%p83_p2)
}
   0xa   :  { %s87_s20 = scalar_lea.vmem %s17_s10, 128  ;;  %p92_p4 = scmp.lt.s32.totalorder %s17_s10, %s17_s10 }
   0xb   :  { %p88_p3 = scmp.ne.s32.totalorder %s17_s10, %s87_s20  ;;  %p93_p5 = scmp.lt.s32.totalorder %s87_s20, %s87_s20 }
   0xd   :  { %p94_p6 = por %p93_p5, %p92_p4 }
   0xf   :  { %p95_p7 = pnand %p94_p6, %p88_p3 }
  0x11   :  { %98 = shalt.err (!%p95_p7)
}
  0x12   :  { %19 = dma.hbm_to_vmem [thread:$0]  %s203_s0, 128, %s17_s10, [#allocation3]  }
  0x13   :  { %s99_s25 = scalar_lea.hbm %s204_s1, 128 }
  0x14   :  { %p100_p8 = scmp.ne.s32.totalorder %s204_s1, %s99_s25  ;;  %p103_p9 = scmp.lt.u32.totalorder %s99_s25, %s204_s1 }
  0x16   :  { %p105_p10 = pnand %p103_p9, %p100_p8 }
  0x18   :  { %108 = shalt.err (!%p105_p10)
}
  0x19   :  { %s109_s30 = scalar_lea.vmem %s27_s12, 128  ;;  %p114_p12 = scmp.lt.s32.totalorder %s27_s12, %s27_s12 }
  0x1a   :  { %p110_p11 = scmp.ne.s32.totalorder %s27_s12, %s109_s30  ;;  %p115_p13 = scmp.lt.s32.totalorder %s109_s30, %s109_s30 }
  0x1c   :  { %p116_p0 = por %p115_p13, %p114_p12 }
  0x1e   :  { %p117_p1 = pnand %p116_p0, %p110_p11 }
  0x20   :  { %120 = shalt.err (!%p117_p1)
}
  0x21   :  { %29 = dma.hbm_to_vmem [thread:$0]  %s204_s1, 128, %s27_s12, [#allocation6]  }
  0x22   :  { %143 = dma.done.wait [#allocation3], 128  }
  0x23   :  { %144 = vsyncadd [#allocation3], 4294967168 }
  0x24   :  { %145 = dma.done.wait [#allocation6], 128  }
  0x25   :  { %146 = vsyncadd [#allocation6], 4294967168  ;;  %v37_v0 = vlaneseq  ;;  %v72_v4 = vld [vmem:[#allocation2] ss:$0 sm:$0xff]  ;;  %v73_v5 = vld [vmem:[#allocation5] ss:$0 sm:$0xff] }
  0x26   :  { %s151_s4 = smov [#allocation7]  }
  0x27   :  { %v38_v1 = vshrl.u32 %v37_v0, 7  ;;  %s62_s5 = sshll.u32 %s151_s4, 4  ;;  %s63_s5 = int_to_ptr.vmem [resolvable:$true] %s62_s5 }
  0x28   :  { %s121_s6 = scalar_lea.vmem %s63_s5, 32  ;;  %p126_p3 = scmp.lt.s32.totalorder %s63_s5, %s63_s5 }
  0x29   :  { %v39_v2 = vmul.u32 4, %v38_v1  ;;  %p122_p2 = scmp.ne.s32.totalorder %s63_s5, %s121_s6  ;;  %p127_p4 = scmp.lt.s32.totalorder %s121_s6, %s121_s6 }
  0x2b   :  { %v42_v3 = vcvt.s32.f32 %v39_v2  ;;  %p128_p5 = por %p127_p4, %p126_p3 }
  0x2d   :  { %v48_v6 = vmul.f32 %v72_v4, %v42_v3  ;;  %p129_p6 = pnand %p128_p5, %p122_p2 }
  0x2f   :  { %v54_v7 = vadd.f32 %v73_v5, %v48_v6 }
  0x31   :  { %55 = vst [vmem:[#allocation7] sm:$0x3] %v54_v7 }
  0x32   :  { %132 = shalt.err (!%p129_p6)
}
  0x33   :  { %s133_s8 = scalar_lea.hbm %s205_s2, 32 }
  0x34   :  { %p134_p7 = scmp.ne.s32.totalorder %s205_s2, %s133_s8  ;;  %p137_p8 = scmp.lt.u32.totalorder %s133_s8, %s205_s2 }
  0x36   :  { %p139_p9 = pnand %p137_p8, %p134_p7 }
  0x38   :  { %142 = shalt.err (!%p139_p9)
}
  0x39   :  { %65 = dma.vmem_to_hbm [thread:$0]  %s63_s5, 32, %s205_s2, [#allocation4]  }
  0x3a   :  { %147 = dma.done.wait [#allocation4], 32  }
  0x3b   :  { %148 = vsyncadd [#allocation4], 4294967264 }
  0x3c   :  { %69 = vsyncpa [#allocation3], 1 }
  0x3d   :  { %70 = vsyncpa [#allocation6], 1 }
  0x3e   :  { %71 = vsyncpa [#allocation4], 1 }

</bundles_post_ra>
